<compile_context>
chip_gen: v5e
topology: v5e:2x2
jax: 0.10.0
libtpu: 0.0.40
codegen_flags: <defaults>
</compile_context>

<pallas_src>
import jax
import jax.numpy as jnp
from jax.experimental import pallas as pl
from jax.experimental.pallas import tpu as pltpu


def _overall_mlp_kernel(x_ref, w1_ref, b1_ref, w2_ref, b2_ref, o_ref):
    # Layer 1 (44 -> 22) on the MXU: f32 operands, f32 accumulation (matches torch f32).
    h1 = jnp.dot(x_ref[...], w1_ref[...], preferred_element_type=jnp.float32)
    h1 = jnp.maximum(h1 + b1_ref[...], 0.0)                       # (tile_m, 22) f32

    # Layer 2 (22 -> 1) folded into the lane-dense output step:
    # (1, 22) . (tile_m, 22)^T -> (1, tile_m): result lands on the lane axis, so the
    # store below is an unmasked, lane-dense vst.
    y = jax.lax.dot_general(
        w2_ref[...], h1,
        dimension_numbers=(((1,), (1,)), ((), ())),
        preferred_element_type=jnp.float32,
    )                                                              # (1, tile_m) f32
    y = jnp.maximum(y + b2_ref[...], 0.0)
    o_ref[...] = y.astype(o_ref.dtype)


def _choose_tile_m(batch, tile_m_max):
    """Pick a batch tile: big enough to amortize grid-step overhead, >=2 tiles when cheap."""
    tile_m_max = max(128, (int(tile_m_max) // 128) * 128)
    if batch <= 256:
        # Single small tile; only sublane (8) alignment needed (block then spans the
        # full output row, satisfying the lane constraint by equality).
        return max(8, ((batch + 7) // 8) * 8)
    if batch <= tile_m_max:
        # Two balanced, 128-aligned tiles: keeps both v7x TensorCores busy via the
        # "parallel" grid axis without a huge mostly-empty single tile.
        half = (batch + 1) // 2
        return ((half + 127) // 128) * 128
    return tile_m_max


def overall_forward_pallas(x, params, *, tile_m=8192):
    """Forward pass of OverallModel with a Pallas TPU kernel.

    x: (B, 44) float32
    params: dict with w1 (44, 22), b1 (1, 22), w2 (22, 1), b2 (1, 1)
            (weights stored as (in, out), i.e. y = x @ W + b).
    """
    B, D_in = x.shape
    assert D_in == 44, f"expected 44 input features, got {D_in}"

    x = x.astype(jnp.float32)                 # no-op for f32 inputs; keeps f32 semantics
    tm = _choose_tile_m(B, tile_m)
    num_tiles = pl.cdiv(B, tm)
    out_cols = num_tiles * tm                 # only the tiny output slab is padded

    w1 = params["w1"].astype(jnp.float32)                  # (44, 22)
    b1 = params["b1"].astype(jnp.float32).reshape(1, 22)   # (1, 22)
    w2 = params["w2"].astype(jnp.float32).reshape(1, 22)   # row form of (22, 1)
    b2 = params["b2"].astype(jnp.float32).reshape(1, 1)    # (1, 1)

    weight_bytes = (44 * 22 + 22 + 22 + 1) * 4
    cost = pl.CostEstimate(
        flops=2 * B * 44 * 22 + 2 * B * 22,
        transcendentals=0,
        bytes_accessed=B * 44 * 4 + B * 4 + weight_bytes,
    )

    out = pl.pallas_call(
        _overall_mlp_kernel,
        out_shape=jax.ShapeDtypeStruct((1, out_cols), jnp.float32),  # lane-dense output slab
        grid_spec=pl.GridSpec(
            grid=(num_tiles,),
            in_specs=[
                pl.BlockSpec((tm, 44), lambda i: (i, 0)),  # x tile (streamed; boundary block
                                                           # may be partially OOB -> dropped cols)
                pl.BlockSpec((44, 22), lambda i: (0, 0)),  # w1 (resident)
                pl.BlockSpec((1, 22), lambda i: (0, 0)),   # b1
                pl.BlockSpec((1, 22), lambda i: (0, 0)),   # w2 row
                pl.BlockSpec((1, 1), lambda i: (0, 0)),    # b2
            ],
            out_specs=pl.BlockSpec((1, tm), lambda i: (0, i)),
        ),
        compiler_params=pltpu.CompilerParams(
            dimension_semantics=("parallel",),        # independent batch tiles -> megacore-shardable
            vmem_limit_bytes=32 * 1024 * 1024,        # covers ~18 MiB peak at tile_m=8192 on all gens
        ),
        cost_estimate=cost,
    )(x, w1, b1, w2, b2)

    # Layout plumbing only: (1, out_cols) -> (B, 1); padded tail columns are discarded here
    # and the padded slab must not be reused downstream.
    return out.reshape(out_cols, 1)[:B]


def init_params(key):
    """Deterministic init mimicking nn.Linear's uniform(-1/sqrt(fan_in), 1/sqrt(fan_in))."""
    def linear_init(k, fan_in, fan_out):
        kw, kb = jax.random.split(k)
        bound = 1.0 / jnp.sqrt(fan_in)
        w = jax.random.uniform(kw, (fan_in, fan_out), jnp.float32, -bound, bound)
        b = jax.random.uniform(kb, (1, fan_out), jnp.float32, -bound, bound)
        return w, b

    k1, k2 = jax.random.split(key)
    w1, b1 = linear_init(k1, 44, 22)
    w2, b2 = linear_init(k2, 22, 1)
    return {"w1": w1, "b1": b1, "w2": w2, "b2": b2}


def _reference_forward(x, p):
    """Pure-JAX f32 reference matching the torch module's forward."""
    h = jnp.maximum(jnp.dot(x, p["w1"], preferred_element_type=jnp.float32) + p["b1"], 0.0)
    y = jnp.maximum(jnp.dot(h, p["w2"], preferred_element_type=jnp.float32) + p["b2"], 0.0)
    return y

# TODO(synk): nn.L1Loss / optim.SGD training state from the PyTorch module is not part of the
# forward pass and is not translated here.


if __name__ == "__main__":
    key = jax.random.PRNGKey(0)
    k_x1, k_x2, k_p = jax.random.split(key, 3)
    params = init_params(k_p)

    # Small batch consistent with the module (44-feature regression MLP).
    B_small = 8
    x_small = jax.random.normal(k_x1, (B_small, 44), dtype=jnp.float32)
    out_small = jax.block_until_ready(overall_forward_pallas(x_small, params))

    # Ragged batch: exercises the zero-copy boundary handling + 2-tile "parallel" grid.
    B_big = 1037
    x_big = jax.random.normal(k_x2, (B_big, 44), dtype=jnp.float32)
    out_big = jax.block_until_ready(overall_forward_pallas(x_big, params))

    assert out_small.shape == (B_small, 1)
    assert out_big.shape == (B_big, 1)

    # Full-f32 semantics now match the torch module's forward; check tightly.
    ref_small = _reference_forward(x_small, params)
    ref_big = _reference_forward(x_big, params)
    assert jnp.allclose(out_small, ref_small, atol=1e-3, rtol=1e-3)
    assert jnp.allclose(out_big, ref_big, atol=1e-3, rtol=1e-3)

    print("KERNEL_OK")
</pallas_src>

<mosaic_0001>
module attributes {stable_mosaic.version = 11 : i64} {
  func.func @_overall_mlp_kernel(%arg0: i32, %arg1: memref<8x44xf32, #tpu.memory_space<vmem>>, %arg2: memref<44x22xf32, #tpu.memory_space<vmem>>, %arg3: memref<1x22xf32, #tpu.memory_space<vmem>>, %arg4: memref<1x22xf32, #tpu.memory_space<vmem>>, %arg5: memref<1x1xf32, #tpu.memory_space<vmem>>, %arg6: memref<1x8xf32, #tpu.memory_space<vmem>>) attributes {dimension_semantics = [#tpu.dimension_semantics<parallel>], iteration_bounds = array<i64: 1>, scalar_prefetch = 0 : i64, scratch_operands = 0 : i64, tpu.core_type = #tpu.core_type<tc>, window_params = [{transform_indices = @transform_0, window_bounds = array<i64: 8, 44>}, {pipeline_mode = #tpu.pipeline_mode<synchronous>, transform_indices = @transform_1, window_bounds = array<i64: 44, 22>}, {pipeline_mode = #tpu.pipeline_mode<synchronous>, transform_indices = @transform_2, window_bounds = array<i64: 1, 22>}, {pipeline_mode = #tpu.pipeline_mode<synchronous>, transform_indices = @transform_3, window_bounds = array<i64: 1, 22>}, {pipeline_mode = #tpu.pipeline_mode<synchronous>, transform_indices = @transform_4, window_bounds = array<i64: 1, 1>}, {transform_indices = @transform_5, window_bounds = array<i64: 1, 8>}]} {
    %c0 = arith.constant 0 : index
    %c0_0 = arith.constant 0 : index
    %0 = vector.load %arg1[%c0, %c0_0] : memref<8x44xf32, #tpu.memory_space<vmem>>, vector<8x44xf32>
    %c0_1 = arith.constant 0 : index
    %c0_2 = arith.constant 0 : index
    %1 = vector.load %arg2[%c0_1, %c0_2] : memref<44x22xf32, #tpu.memory_space<vmem>>, vector<44x22xf32>
    %cst = arith.constant dense<0.000000e+00> : vector<8x22xf32>
    %2 = tpu.matmul %0, %1, %cst {dimension_numbers = #tpu.dot_dimension_numbers<[1], [0], [0], [1], [0, 0, 1, 1], [], []>} : vector<8x44xf32>, vector<44x22xf32>, vector<8x22xf32> -> vector<8x22xf32>
    %c0_3 = arith.constant 0 : index
    %c0_4 = arith.constant 0 : index
    %3 = vector.load %arg3[%c0_3, %c0_4] : memref<1x22xf32, #tpu.memory_space<vmem>>, vector<1x22xf32>
    %4 = vector.broadcast %3 : vector<1x22xf32> to vector<8x22xf32>
    %5 = arith.addf %2, %4 : vector<8x22xf32>
    %cst_5 = arith.constant 0.000000e+00 : f32
    %6 = vector.broadcast %cst_5 : f32 to vector<8x22xf32>
    %7 = arith.maximumf %5, %6 : vector<8x22xf32>
    %c0_6 = arith.constant 0 : index
    %c0_7 = arith.constant 0 : index
    %8 = vector.load %arg4[%c0_6, %c0_7] : memref<1x22xf32, #tpu.memory_space<vmem>>, vector<1x22xf32>
    %cst_8 = arith.constant dense<0.000000e+00> : vector<1x8xf32>
    %9 = tpu.matmul %8, %7, %cst_8 {dimension_numbers = #tpu.dot_dimension_numbers<[1], [1], [0], [0], [0, 0, 1, 0], [], []>} : vector<1x22xf32>, vector<8x22xf32>, vector<1x8xf32> -> vector<1x8xf32>
    %c0_9 = arith.constant 0 : index
    %c0_10 = arith.constant 0 : index
    %10 = vector.load %arg5[%c0_9, %c0_10] : memref<1x1xf32, #tpu.memory_space<vmem>>, vector<1x1xf32>
    %11 = vector.broadcast %10 : vector<1x1xf32> to vector<1x8xf32>
    %12 = arith.addf %9, %11 : vector<1x8xf32>
    %cst_11 = arith.constant 0.000000e+00 : f32
    %13 = vector.broadcast %cst_11 : f32 to vector<1x8xf32>
    %14 = arith.maximumf %12, %13 : vector<1x8xf32>
    %c0_12 = arith.constant 0 : index
    %c0_13 = arith.constant 0 : index
    %15 = vector.load %arg6[%c0_12, %c0_13] : memref<1x8xf32, #tpu.memory_space<vmem>>, vector<1x8xf32>
    tpu.vector_store %arg6[%c0_12, %c0_13], %14 {strides = array<i32>} : memref<1x8xf32, #tpu.memory_space<vmem>>, vector<1x8xf32>,
    return
  }
  func.func @transform_0(%arg0: i32) -> (i32, i32) {
    %c0_i32 = arith.constant 0 : i32
    %c0_i32_0 = arith.constant 0 : i32
    return %arg0, %c0_i32 : i32, i32
  }
  func.func @transform_1(%arg0: i32) -> (i32, i32) {
    %c0_i32 = arith.constant 0 : i32
    %c0_i32_0 = arith.constant 0 : i32
    %c0_i32_1 = arith.constant 0 : i32
    return %c0_i32, %c0_i32_0 : i32, i32
  }
  func.func @transform_2(%arg0: i32) -> (i32, i32) {
    %c0_i32 = arith.constant 0 : i32
    %c0_i32_0 = arith.constant 0 : i32
    %c0_i32_1 = arith.constant 0 : i32
    return %c0_i32, %c0_i32_0 : i32, i32
  }
  func.func @transform_3(%arg0: i32) -> (i32, i32) {
    %c0_i32 = arith.constant 0 : i32
    %c0_i32_0 = arith.constant 0 : i32
    %c0_i32_1 = arith.constant 0 : i32
    return %c0_i32, %c0_i32_0 : i32, i32
  }
  func.func @transform_4(%arg0: i32) -> (i32, i32) {
    %c0_i32 = arith.constant 0 : i32
    %c0_i32_0 = arith.constant 0 : i32
    %c0_i32_1 = arith.constant 0 : i32
    return %c0_i32, %c0_i32_0 : i32, i32
  }
  func.func @transform_5(%arg0: i32) -> (i32, i32) {
    %c0_i32 = arith.constant 0 : i32
    %c0_i32_0 = arith.constant 0 : i32
    return %c0_i32, %arg0 : i32, i32
  }
}

</mosaic_0001>

<bundles_post_ra>
// kernel: tpu_custom_call.1
= control target key start
LH: loop header
LB: loop body
LE: loop exit
PB: predicated region body
PF: predicated region fallthrough
CT: control target
= control target key end

     0   :  { %s216_s0 = inlined_call_operand.vmem [shape: f32[8,44], index: 0, kind: input, shape index: {}]   ;;  %s217_s1 = inlined_call_operand.vmem [shape: f32[44,22], index: 1, kind: input, shape index: {}]   ;;  %s218_s2 = inlined_call_operand.vmem [shape: f32[1,22], index: 2, kind: input, shape index: {}]   ;;  %s219_s3 = inlined_call_operand.vmem [shape: f32[1,22], index: 3, kind: input, shape index: {}]   ;;  %s220_s4 = inlined_call_operand.<no memory space> [shape: f32[1,1], index: 4, kind: input, shape index: {}]   ;;  %s221_s5 = inlined_call_operand.hbm [shape: f32[1,8], index: 5, kind: output, shape index: {}]  }
   0x1   :  { %v10_v0 = vstv %s220_s4 }
   0x2   :  { %11 = vst [vmem:[#allocation2] sm:$0x1] %v10_v0 }
   0x3   :  { %v29_v1 = vld [vmem:[%s217_s1 + $0x28] sm:$0xf]  ;;  %vm38_vm0 = vcmask 1043456   ;;  %v28_v2 = vld [vmem:[%s217_s1 + $0x20] sm:$0xff]  ;;  %v27_v3 = vld [vmem:[%s217_s1 + $0x18] sm:$0xff] }
   0x4   :  { %117 = vmatpush.msk.msra.mxu0 %vm38_vm0, %v29_v1 }
   0x6   :  { %53 = vmatpush.msra.mxu0 %v28_v2 }
   0x7   :  { %12 = vsyncpa [#allocation4], 0  ;;  %v26_v4 = vld [vmem:[%s217_s1 + $0x10] sm:$0xff]  ;;  %v25_v5 = vld [vmem:[%s217_s1 + $0x8] sm:$0xff]  ;;  %vm34_vm1 = vcmask 359424   ;;  %v151_v9 = vmov 0  }
   0x8   :  { %54 = vmatpush.msra.mxu0 %v27_v3  ;;  %v24_v6 = vld [vmem:[%s217_s1] sm:$0xff]  ;;  %123 = vset.pattern.permute.xlu0 %v151_v9  ;;  %vm71_vm2 = vcmask 179200   ;;  %s108_s14 = sshll.u32 %s221_s5, 4  ;;  %vm99_vm3 = vcmask 57344   ;;  %s109_s14 = int_to_ptr.hbm [resolvable:$true] %s108_s14 }
   0x9   :  { %v23_v7 = vld [vmem:[%s216_s0] sm:$0xff]  ;;  %s152_s0 = smov [#allocation3]  }
   0xa   :  { %55 = vmatpush.msra.mxu0 %v26_v4  ;;  %v64_v8 = vld [vmem:[#allocation2] sm:$0x1]  ;;  %s106_s11 = sshll.u32 %s152_s0, 4  ;;  %s107_s11 = int_to_ptr.vmem [resolvable:$true] %s106_s11 }
   0xb   :  { %67 = vperm.xlu0 %123, %v64_v8   ;;  %v124_v10 = vld [vmem:[%s218_s2] ss:$0 sm:$0xff] }
   0xc   :  { %56 = vmatpush.msra.mxu0 %v25_v5  ;;  %v63_v14 = vld [vmem:[%s219_s3] sm:$0x1] }
   0xe   :  { %57 = vmatpush.msra.mxu0 %v24_v6 }
   0xf   :  { %118 = vmatmul.msk.f32.vlgmr.msra.gmra.mxu0 %vm34_vm1, %v23_v7 }
  0x7d   :  { %v68_v15 = vpop.permute.xlu0 %67 }
  0x7e   :  { %v70_v16 = vperm.slane %v68_v15, 0 }
  0x8c   :  { %v59_v11 = vpop.f32.mrf.mxu0 }
  0x8d   :  { %v60_v12 = vadd.f32 %v124_v10, %v59_v11 }
  0x8f   :  { %v62_v13 = vmax.f32 %v60_v12, 0.0 }
  0x91   :  { %119 = vmatpush.xpose.msk.msra.mxu1 %vm71_vm2, %v62_v13 }
  0x94   :  { %120 = vmatmul.msk.f32.vlgmr.msra.gmra.mxu1 %vm71_vm2, %v63_v14 }
 0x111   :  { %v95_v17 = vpop.f32.mrf.mxu1 }
 0x112   :  { %v96_v18 = vadd.f32 %v95_v17, %v70_v16 }
 0x114   :  { %v98_v19 = vmax.f32 %v96_v18, 0.0 }
 0x116   :  { %100 = vst.msk [vmem:[#allocation3] sm:$0x1] %vm99_vm3, %v98_v19 }
 0x117   :  { %111 = dma.vmem_to_hbm [thread:$0]  %s107_s11, 16, %s109_s14, [#allocation4]  }
 0x118   :  { %149 = dma.done.wait [#allocation4], 16  }
 0x119   :  { %150 = vsyncadd [#allocation4], 4294967280 }
 0x11a   :  { %116 = vsyncpa [#allocation4], 1 }

</bundles_post_ra>
